<compile_context>
chip_gen: v7x
topology: tpu7x:2x2x1
jax: 0.10.0
libtpu: 0.0.40
codegen_flags: <defaults>
</compile_context>

<pallas_src>
import jax
import jax.numpy as jnp
from jax.experimental import pallas as pl
from jax.experimental.pallas import tpu as pltpu

_LANE = 128                     # vreg lane width
_TARGET_TILE_BYTES = 2 << 20    # ~2 MiB (padded) payload per pipelined buffer
_MIN_SPLIT_BYTES = 1 << 20      # below this a (1,1) grid is acceptable
_VMEM_LIMIT_BYTES = 32 << 20    # scoped-VMEM request; safe on v5e/v6e/v7x


def _normalization_kernel(scale_ref, shift_ref, img_ref, out_ref):
    # scale_ref / shift_ref : (R, 1)  f32 per-row affine params
    # img_ref   / out_ref   : (R, L)  image tile
    # y = (x - mean) / std  ==  x * (1/std) + (-mean/std): one VPU mul-add.
    x = img_ref[...].astype(jnp.float32)
    out_ref[...] = (x * scale_ref[...] + shift_ref[...]).astype(out_ref.dtype)


def _sublane_multiple(itemsize):
    # f32 -> 8, bf16/f16 -> 16, int8/fp8 -> 32 (packed-sublane layouts).
    return max(8, 32 // itemsize)


def _choose_2d_layout(N, C, H, W):
    """Flatten NCHW to (rows, cols) where every row maps to a single channel.

    If N*C < 8, fold the smallest divisor of H into the row axis that (a) keeps
    cols 128-aligned and (b) fills the 8 sublanes (ideally rows % 8 == 0)."""
    rows, cols, fold = N * C, H * W, 1
    if rows >= 8:
        return rows, cols, fold
    fallback = None
    for d in range(2, H + 1):
        if H % d != 0:
            continue
        r = N * C * d
        c = (H // d) * W
        if c % _LANE != 0:
            continue                      # would lose lane density
        if r >= 8:
            if r % 8 == 0:
                return r, c, d            # smallest fold with full sublane groups
            if fallback is None:
                fallback = (r, c, d)
    if fallback is not None:
        return fallback
    return rows, cols, fold


def _choose_blocks(rows, cols, itemsize, target_bytes=_TARGET_TILE_BYTES):
    """Pick (row_block, lane_block) obeying TPU (sublane, 128) tiling rules,
    using padded-byte accounting, ~target_bytes per pipelined buffer, and
    enough grid steps to pipeline DMAs / split across v7x's 2 TensorCores."""
    sub = _sublane_multiple(itemsize)

    # ---- lane (last-dim) block: multiple of 128, or the full row ----------
    lane_units_total = pl.cdiv(cols, _LANE)
    per_lane_unit_bytes = sub * _LANE * itemsize
    fixed_group_bytes = sub * 2 * _LANE * 4      # scale+shift pad to 128 lanes
    max_lane_units = max(1, (target_bytes - fixed_group_bytes) // per_lane_unit_bytes)
    if lane_units_total <= max_lane_units:
        lane_block = cols                        # whole row in one block
    else:
        k = max_lane_units
        if cols % _LANE == 0:
            # prefer a block that divides the row: no ragged masked tail tile
            while lane_units_total % k != 0:
                k -= 1
        lane_block = k * _LANE
    padded_lanes = pl.cdiv(lane_block, _LANE) * _LANE

    # ---- row block: multiple of the dtype's sublane packing ---------------
    group_bytes = sub * (padded_lanes * itemsize + 2 * _LANE * 4)
    n_groups = max(1, target_bytes // group_bytes)
    if n_groups * sub >= rows:
        row_block = rows                         # full extent (always legal)
    else:
        row_block = n_groups * sub

    # ---- guarantee enough grid steps for pipelining + megacore ------------
    total_bytes = rows * cols * itemsize
    if total_bytes >= 8 * target_bytes:
        min_programs = 8
    elif total_bytes >= _MIN_SPLIT_BYTES:
        min_programs = 4
    else:
        min_programs = 1

    def n_programs(rb, lb):
        return pl.cdiv(rows, rb) * pl.cdiv(cols, lb)

    while n_programs(row_block, lane_block) < min_programs:
        if row_block > sub:                      # split rows first (keeps wide stores)
            row_block = max(sub, ((row_block // 2) // sub) * sub)
            continue
        lane_units = pl.cdiv(lane_block, _LANE)
        if lane_units > 1:                       # then split the lane axis
            lane_block = (lane_units // 2) * _LANE
            continue
        break                                    # nothing left to split

    return row_block, lane_block


def normalization(img, mean, std, *, donate=False):
    """(img - mean[:,None,None]) / std[:,None,None] for NCHW `img`."""
    if img.ndim != 4:
        raise ValueError(f"expected NCHW input, got shape {img.shape}")
    if not jnp.issubdtype(img.dtype, jnp.floating):
        raise TypeError(f"Normalization expects a floating dtype, got {img.dtype}")

    N, C, H, W = img.shape
    out_dtype = img.dtype
    itemsize = jnp.dtype(out_dtype).itemsize

    rows, cols, fold = _choose_2d_layout(N, C, H, W)
    x = img.reshape(rows, cols)

    # Fold the per-channel normalization into a per-row affine (row r of the
    # 2-D view belongs to channel (r // fold) % C).
    mean = jnp.asarray(mean, dtype=jnp.float32).reshape(-1)
    std = jnp.asarray(std, dtype=jnp.float32).reshape(-1)
    inv_std = 1.0 / std                                    # one divide per channel
    scale = jnp.repeat(jnp.tile(inv_std, N), fold).reshape(rows, 1)
    shift = jnp.repeat(jnp.tile(-mean * inv_std, N), fold).reshape(rows, 1)

    row_block, lane_block = _choose_blocks(rows, cols, itemsize)
    grid = (pl.cdiv(rows, row_block), pl.cdiv(cols, lane_block))

    cost = pl.CostEstimate(
        flops=2 * rows * cols,                   # one mul + one add per element
        transcendentals=0,
        bytes_accessed=2 * rows * cols * itemsize + 2 * rows * 4,
    )

    out = pl.pallas_call(
        _normalization_kernel,
        out_shape=jax.ShapeDtypeStruct((rows, cols), out_dtype),
        grid=grid,
        in_specs=[
            # scale/shift are j-invariant; with the lane axis (j) innermost
            # their tiny DMAs only re-issue when the row block (i) changes.
            pl.BlockSpec((row_block, 1), lambda i, j: (i, 0)),
            pl.BlockSpec((row_block, 1), lambda i, j: (i, 0)),
            pl.BlockSpec((row_block, lane_block), lambda i, j: (i, j)),
        ],
        out_specs=pl.BlockSpec((row_block, lane_block), lambda i, j: (i, j)),
        compiler_params=pltpu.CompilerParams(
            # elementwise, independent tiles: both axes megacore-splittable
            dimension_semantics=("parallel", "parallel"),
            # tiles are budgeted (padded) to ~2 MiB each -> ~8-10 MiB
            # double-buffered footprint; 32 MiB scoped VMEM adds headroom and
            # is below physical VMEM on every generation.
            vmem_limit_bytes=_VMEM_LIMIT_BYTES,
        ),
        cost_estimate=cost,
        input_output_aliases=({2: 0} if donate else {}),
    )(scale, shift, x)

    return out.reshape(N, C, H, W)


if __name__ == "__main__":
    # ImageNet constants used by style_transfer.py's Normalization module.
    mean = jnp.array([0.485, 0.456, 0.406], dtype=jnp.float32)
    std = jnp.array([0.229, 0.224, 0.225], dtype=jnp.float32)

    key = jax.random.PRNGKey(0)
    k1, k2 = jax.random.split(key)

    # f32 NCHW input: batch=2, channels=3, spatial 16x16.
    img = jax.random.uniform(k1, (2, 3, 16, 16), dtype=jnp.float32)
    out = jax.block_until_ready(normalization(img, mean, std))
    ref = (img - mean[None, :, None, None]) / std[None, :, None, None]
    assert out.shape == ref.shape and out.dtype == ref.dtype
    assert jnp.max(jnp.abs(out - ref)) < 1e-5

    # bf16 path (exercises the 16-row sublane packing rule; compute stays f32).
    img_bf = jax.random.uniform(k2, (2, 3, 32, 32), dtype=jnp.float32).astype(jnp.bfloat16)
    out_bf = jax.block_until_ready(normalization(img_bf, mean, std))
    ref_bf = (img_bf.astype(jnp.float32) - mean[None, :, None, None]) / std[None, :, None, None]
    assert out_bf.shape == img_bf.shape and out_bf.dtype == jnp.bfloat16
    assert jnp.max(jnp.abs(out_bf.astype(jnp.float32) - ref_bf)) < 5e-2

    print("KERNEL_OK")
</pallas_src>

<mosaic_0001>
module attributes {stable_mosaic.version = 11 : i64} {
  func.func @_normalization_kernel(%arg0: i32, %arg1: i32, %arg2: memref<12x1xf32, #tpu.memory_space<vmem>>, %arg3: memref<12x1xf32, #tpu.memory_space<vmem>>, %arg4: memref<12x128xf32, #tpu.memory_space<vmem>>, %arg5: memref<12x128xf32, #tpu.memory_space<vmem>>) attributes {dimension_semantics = [#tpu.dimension_semantics<parallel>, #tpu.dimension_semantics<parallel>], iteration_bounds = array<i64: 1, 1>, scalar_prefetch = 0 : i64, scratch_operands = 0 : i64, tpu.core_type = #tpu.core_type<tc>, window_params = [{transform_indices = @transform_0, window_bounds = array<i64: 12, 1>}, {transform_indices = @transform_1, window_bounds = array<i64: 12, 1>}, {transform_indices = @transform_2, window_bounds = array<i64: 12, 128>}, {transform_indices = @transform_3, window_bounds = array<i64: 12, 128>}]} {
    %c0 = arith.constant 0 : index
    %c0_0 = arith.constant 0 : index
    %0 = vector.load %arg4[%c0, %c0_0] : memref<12x128xf32, #tpu.memory_space<vmem>>, vector<12x128xf32>
    %c0_1 = arith.constant 0 : index
    %c0_2 = arith.constant 0 : index
    %1 = vector.load %arg2[%c0_1, %c0_2] : memref<12x1xf32, #tpu.memory_space<vmem>>, vector<12x1xf32>
    %2 = vector.broadcast %1 : vector<12x1xf32> to vector<12x128xf32>
    %3 = arith.mulf %0, %2 : vector<12x128xf32>
    %c0_3 = arith.constant 0 : index
    %c0_4 = arith.constant 0 : index
    %4 = vector.load %arg3[%c0_3, %c0_4] : memref<12x1xf32, #tpu.memory_space<vmem>>, vector<12x1xf32>
    %5 = vector.broadcast %4 : vector<12x1xf32> to vector<12x128xf32>
    %6 = arith.addf %3, %5 : vector<12x128xf32>
    %c0_5 = arith.constant 0 : index
    %c0_6 = arith.constant 0 : index
    %7 = vector.load %arg5[%c0_5, %c0_6] : memref<12x128xf32, #tpu.memory_space<vmem>>, vector<12x128xf32>
    tpu.vector_store %arg5[%c0_5, %c0_6], %6 {strides = array<i32>} : memref<12x128xf32, #tpu.memory_space<vmem>>, vector<12x128xf32>,
    return
  }
  func.func @transform_0(%arg0: i32, %arg1: i32) -> (i32, i32) {
    %c0_i32 = arith.constant 0 : i32
    %c0_i32_0 = arith.constant 0 : i32
    return %arg0, %c0_i32 : i32, i32
  }
  func.func @transform_1(%arg0: i32, %arg1: i32) -> (i32, i32) {
    %c0_i32 = arith.constant 0 : i32
    %c0_i32_0 = arith.constant 0 : i32
    return %arg0, %c0_i32 : i32, i32
  }
  func.func @transform_2(%arg0: i32, %arg1: i32) -> (i32, i32) {
    %c0_i32 = arith.constant 0 : i32
    return %arg0, %arg1 : i32, i32
  }
  func.func @transform_3(%arg0: i32, %arg1: i32) -> (i32, i32) {
    %c0_i32 = arith.constant 0 : i32
    return %arg0, %arg1 : i32, i32
  }
}

</mosaic_0001>

<bundles_post_ra>
// kernel: tpu_custom_call.1
= control target key start
LH: loop header
LB: loop body
LE: loop exit
PB: predicated region body
PF: predicated region fallthrough
CT: control target
= control target key end

     0   :  { %v93_v2 = vmov 0   ;;  %s147_s0 = inlined_call_operand.vmem [shape: f32[12,1], index: 0, kind: input, shape index: {}]   ;;  %s148_s1 = inlined_call_operand.vmem [shape: f32[12,1], index: 1, kind: input, shape index: {}]   ;;  %s149_s2 = inlined_call_operand.vmem [shape: f32[12,128], index: 2, kind: input, shape index: {}]   ;;  %s150_s3 = inlined_call_operand.hbm [shape: f32[12,128], index: 3, kind: output, shape index: {}]  }
   0x1   :  { %v31_v0 = vld [vmem:[%s148_s1] sm:$0xff]  ;;  %68 = vset.pattern.permute.xlu1 %v93_v2  ;;  %67 = vset.pattern.permute.xlu0 %v93_v2 }
   0x2   :  { %v17_v1 = vld [vmem:[%s147_s0] sm:$0xff] }
   0x3   :  { %8 = vsyncpa [#allocation3], 0  ;;  %35 = vperm.xlu1 %68, %v31_v0   ;;  %21 = vperm.xlu0 %67, %v17_v1   ;;  %v32_v3 = vld [vmem:[%s148_s1 + $0x8] sm:$0xf]  ;;  %v15_v5 = vld [vmem:[%s149_s2] sm:$0xff]  ;;  %s94_s24 = smov [#allocation2]  }
   0x4   :  { %v18_v4 = vld [vmem:[%s147_s0 + $0x8] sm:$0xf]  ;;  %s52_s1 = sshll.u32 %s94_s24, 4  ;;  %s53_s1 = int_to_ptr.vmem [resolvable:$true] %s52_s1 }
   0x5   :  { %v16_v9 = vld [vmem:[%s149_s2 + $0x8] sm:$0xf]  ;;  %s69_s0 = scalar_lea.vmem %s53_s1, 256  ;;  %p74_p1 = scmp.lt.s32.totalorder %s53_s1, %s53_s1 }
   0x6   :  { %p70_p0 = scmp.ne.s32.totalorder %s53_s1, %s69_s0  ;;  %p75_p2 = scmp.lt.s32.totalorder %s69_s0, %s69_s0 }
   0x7   :  { %40 = vperm.xlu1 %68, %v32_v3   ;;  %26 = vperm.xlu0 %67, %v18_v4  }
   0x8   :  { %p76_p3 = por %p75_p2, %p74_p1 }
   0xa   :  { %p77_p4 = pnand %p76_p3, %p70_p0 }
  0x82   :  { %v36_v6 = vpop.permute.xlu1 %35  ;;  %v22_v7 = vpop.permute.xlu0 %21 }
  0x83   :  { %v29_v8 = vmul.f32 %v22_v7, %v15_v5 }
  0x85   :  { %v43_v10 = vadd.f32 %v36_v6, %v29_v8 }
  0x86   :  { %v27_v11 = vpop.permute.xlu0 %26  ;;  %v41_v13 = vpop.permute.xlu1 %40 }
  0x87   :  { %45 = vst [vmem:[#allocation2] sm:$0xff] %v43_v10  ;;  %v30_v12 = vmul.f32 %v27_v11, %v16_v9 }
  0x89   :  { %v44_v14 = vadd.f32 %v41_v13, %v30_v12 }
  0x8b   :  { %46 = vst [vmem:[#allocation2 + $0x8] sm:$0xf] %v44_v14 }
  0x8c   :  { %80 = shalt.err (!%p77_p4)
}
  0x8d   :  { %s81_s2 = scalar_lea.hbm %s150_s3, 256 }
  0x8e   :  { %p82_p5 = scmp.ne.s32.totalorder %s150_s3, %s81_s2  ;;  %p85_p6 = scmp.lt.u32.totalorder %s81_s2, %s150_s3 }
  0x90   :  { %p87_p7 = pnand %p85_p6, %p82_p5 }
  0x92   :  { %90 = shalt.err (!%p87_p7)
}
  0x93   :  { %s95_s4 = smov 128   ;;  %s96_s5 = smov 8  }
  0x94   :  { %58 = dma.vmem_to_hbm [thread:$0]  %s53_s1, 256, %s150_s3, [#allocation3], %s95_s4, %s95_s4, %s96_s5  }
  0x95   :  { %91 = dma.done.wait [#allocation3], 256  }
  0x96   :  { %92 = vsyncadd [#allocation3], 4294967040 }
  0x97   :  { %62 = vsyncpa [#allocation3], 1 }

</bundles_post_ra>
